<compile_context>
chip_gen: v6e
topology: v6e:2x2x1
jax: 0.10.0
libtpu: 0.0.40
codegen_flags: <defaults>
</compile_context>

<pallas_src>
import jax
import jax.numpy as jnp
from jax.experimental import pallas as pl
from jax.experimental.pallas import tpu as pltpu

_MIB = 1024 * 1024


def _round_up(x, m):
    return ((x + m - 1) // m) * m


def _round_down(x, m):
    return max(m, (x // m) * m)


def _tpu_vmem_capacity_bytes():
    """Physical per-core VMEM; defaults to 128 MiB if the query is unavailable."""
    try:
        info = pltpu.get_tpu_info()
        cap = getattr(info, "vmem_capacity_bytes", None)
        if cap:
            return int(cap)
    except Exception:
        pass
    return 128 * _MIB


def _choose_tiles(n, in_size, f_pad, x_bytes, w_bytes, out_bytes, budget, multi_tc,
                  max_rows=2048):
    """Pick (tile_n, tile_f, params_resident) against the VMEM budget.

    Working set model:
      x tiles:   2 * tile_n * in_size * x_bytes     (double-buffered)
      out tiles: 2 * tile_n * tile_f * out_bytes    (double-buffered)
      weights:   bufs * in_size * tile_f * w_bytes  (bufs=1 if resident)
      bias:      bufs * tile_f * 4
    """
    n8 = max(8, _round_up(n, 8))

    def row_cost(tile_f):
        return 2 * (in_size * x_bytes + tile_f * out_bytes)

    # Prefer keeping the whole F axis resident (single-buffered params).
    resident_full = in_size * f_pad * w_bytes + f_pad * 4
    if resident_full + 8 * row_cost(f_pad) <= budget:
        tile_f = f_pad
        params_resident = True
        resident = resident_full
    else:
        # Tile the F axis; params get double-buffered by the pipeline.
        params_resident = False
        per_f = 2 * in_size * w_bytes + 2 * 4 + 2 * 128 * out_bytes
        avail = budget - 2 * 128 * in_size * x_bytes
        tile_f = _round_down(min(f_pad, max(128, avail // per_f)), 128)
        resident = 2 * (in_size * tile_f * w_bytes + tile_f * 4)

    # Largest sublane-aligned row tile that fits; cap bounds per-step latency.
    avail_rows = max(8, (budget - resident) // row_cost(tile_f))
    tile_n = max(8, min(_round_down(avail_rows, 8), max_rows, n8))

    # v7x only: keep the "parallel" N axis split (evenly) across both TCs.
    if multi_tc and n > 8:
        steps = pl.cdiv(n, tile_n)
        even_steps = max(2, 2 * pl.cdiv(steps, 2))
        tile_n = min(tile_n, max(8, _round_up(pl.cdiv(n, even_steps), 8)))

    return tile_n, tile_f, params_resident


def _cont_emb_kernel(x_ref, w_ref, b_ref, o_ref):
    # Weights arrive pre-masked; MXU matmul with f32 accumulation + bias add,
    # one lane-dense store of the full (tile_n, tile_f) slab.
    acc = jnp.dot(x_ref[...], w_ref[...], preferred_element_type=jnp.float32)
    o_ref[...] = (acc + b_ref[...]).astype(o_ref.dtype)


def continuous_embedding_forward(x, weights, mask, bias, *, in_size, out_size,
                                 use_pallas=None, compute_dtype=None,
                                 out_dtype=None, min_pallas_out_bytes=2 * _MIB):
    """x: (N, in_size) -> (N, in_size, out_size). Matches the PyTorch forward."""
    N = x.shape[0]
    F = in_size * out_size
    out_dtype = x.dtype if out_dtype is None else out_dtype
    in_dtype = x.dtype if compute_dtype is None else compute_dtype

    # Fold the static mask into the weights once (tiny XLA elementwise op).
    w_eff = (weights * mask.astype(weights.dtype)).astype(in_dtype)
    bias2d = bias.reshape(1, F).astype(jnp.float32)
    x_in = x.astype(in_dtype)

    out_bytes_total = N * F * jnp.dtype(out_dtype).itemsize
    if use_pallas is None:
        use_pallas = out_bytes_total >= min_pallas_out_bytes
    if not use_pallas:
        # Launch/pipeline overhead dominates for tiny N; let XLA fuse it.
        out = (jnp.dot(x_in, w_eff, preferred_element_type=jnp.float32)
               + bias2d).astype(out_dtype)
        return out.reshape(N, in_size, out_size)

    # Lane-dense output: pad the F axis to a multiple of 128 if needed.
    f_pad = _round_up(F, 128)
    if f_pad != F:
        w_eff = jnp.pad(w_eff, ((0, 0), (0, f_pad - F)))
        bias2d = jnp.pad(bias2d, ((0, 0), (0, f_pad - F)))

    cap = _tpu_vmem_capacity_bytes()
    # TODO(synk): switch to an explicit chip-version query once TpuInfo exposes
    # it stably; "<=64 MiB VMEM => 2 TensorCores (v7x-like)" is a proxy.
    multi_tc = cap <= 64 * _MIB
    budget = min(cap - 8 * _MIB, 100 * _MIB)

    x_bytes = jnp.dtype(in_dtype).itemsize
    w_bytes = jnp.dtype(w_eff.dtype).itemsize
    o_bytes = jnp.dtype(out_dtype).itemsize
    tile_n, tile_f, params_resident = _choose_tiles(
        N, in_size, f_pad, x_bytes, w_bytes, o_bytes, budget, multi_tc)

    grid = (pl.cdiv(N, tile_n), pl.cdiv(f_pad, tile_f))
    params_resident = params_resident and grid[1] == 1

    working_set = (2 * tile_n * in_size * x_bytes
                   + 2 * tile_n * tile_f * o_bytes
                   + (1 if params_resident else 2)
                   * (in_size * tile_f * w_bytes + tile_f * 4))
    vmem_limit = int(min(cap - 8 * _MIB, max(32 * _MIB, working_set + 4 * _MIB)))

    cost = pl.CostEstimate(
        flops=2 * N * in_size * F,
        transcendentals=0,
        bytes_accessed=(N * in_size * x_bytes + in_size * f_pad * w_bytes
                        + f_pad * 4 + N * f_pad * o_bytes),
    )

    def build(single_buffer_params):
        pm = pl.Buffered(1) if single_buffer_params else None

        def spec(shape, index_map, pipeline_mode=None):
            if pipeline_mode is None:
                return pl.BlockSpec(shape, index_map)
            return pl.BlockSpec(shape, index_map, pipeline_mode=pipeline_mode)

        return pl.pallas_call(
            _cont_emb_kernel,
            out_shape=jax.ShapeDtypeStruct((N, f_pad), out_dtype),
            grid_spec=pltpu.PrefetchScalarGridSpec(
                num_scalar_prefetch=0,
                grid=grid,
                in_specs=[
                    spec((tile_n, in_size), lambda i, j: (i, 0)),      # x tile
                    spec((in_size, tile_f), lambda i, j: (0, j), pm),  # weights
                    spec((1, tile_f), lambda i, j: (0, j), pm),        # bias
                ],
                out_specs=pl.BlockSpec((tile_n, tile_f), lambda i, j: (i, j)),
            ),
            compiler_params=pltpu.CompilerParams(
                dimension_semantics=("parallel", "parallel"),
                vmem_limit_bytes=vmem_limit,
            ),
            cost_estimate=cost,
        )

    if params_resident:
        try:
            out_flat = build(True)(x_in, w_eff, bias2d)
        except Exception:
            # Fallback if single-buffered (Buffered(1)) params are rejected.
            out_flat = build(False)(x_in, w_eff, bias2d)
    else:
        out_flat = build(False)(x_in, w_eff, bias2d)

    if f_pad != F:
        out_flat = out_flat[:, :F]  # copy only paid when F isn't 128-aligned
    return out_flat.reshape(N, in_size, out_size)


def init_continuous_embedding(key, in_size, out_size):
    """Deterministic re-implementation of the PyTorch __init__."""
    F = in_size * out_size
    k_w, k_b = jax.random.split(key)

    # mask: True everywhere except the block-diagonal slots (PyTorch polarity).
    row_idx = jnp.arange(in_size)[:, None]
    col_idx = jnp.arange(F)[None, :]
    on_diag = (col_idx >= row_idx * out_size) & (col_idx < (row_idx + 1) * out_size)
    mask = ~on_diag                                              # bool (in_size, F)

    # weights ~ N(0, 0.1), then weights[mask] = 0 (only block diagonal survives)
    weights = 0.1 * jax.random.normal(k_w, (in_size, F), dtype=jnp.float32)
    weights = jnp.where(mask, 0.0, weights)

    # bias ~ U[0, 1)
    bias = jax.random.uniform(k_b, (F,), dtype=jnp.float32)

    return weights, mask.astype(jnp.float32), bias


if __name__ == "__main__":
    in_size, out_size = 8, 32
    N = 16

    key = jax.random.PRNGKey(0)
    k_param, k_x, k_w2 = jax.random.split(key, 3)

    weights_init, mask_f32, bias = init_continuous_embedding(k_param, in_size, out_size)
    # "Trained" weights (nonzero off-diagonal) so the masked matmul is non-trivial.
    weights = weights_init + 0.05 * jax.random.normal(
        k_w2, (in_size, in_size * out_size), dtype=jnp.float32)
    x = jax.random.normal(k_x, (N, in_size), dtype=jnp.float32)
    w_eff_ref = weights * mask_f32

    # 1) Pallas path (forced) — exact f32 parity with the PyTorch forward.
    out = jax.block_until_ready(continuous_embedding_forward(
        x, weights, mask_f32, bias, in_size=in_size, out_size=out_size,
        use_pallas=True))
    ref = (x @ w_eff_ref + bias).reshape(-1, in_size, out_size)
    assert out.shape == (N, in_size, out_size)
    assert jnp.allclose(out, ref, atol=1e-5, rtol=1e-5)

    # 2) Ragged / larger N — exercises the masked boundary block (no pad/slice copy).
    x2 = jax.random.normal(jax.random.PRNGKey(1), (1003, in_size), dtype=jnp.float32)
    out2 = jax.block_until_ready(continuous_embedding_forward(
        x2, weights, mask_f32, bias, in_size=in_size, out_size=out_size,
        use_pallas=True))
    ref2 = (x2 @ w_eff_ref + bias).reshape(-1, in_size, out_size)
    assert out2.shape == (1003, in_size, out_size)
    assert jnp.allclose(out2, ref2, atol=1e-5, rtol=1e-5)

    # 3) Small-N auto fast path (plain XLA) still matches.
    out3 = jax.block_until_ready(continuous_embedding_forward(
        x, weights, mask_f32, bias, in_size=in_size, out_size=out_size))
    assert jnp.allclose(out3, ref, atol=1e-5, rtol=1e-5)

    # 4) Optional bf16-output path (gated; intentionally breaks exact parity).
    out4 = jax.block_until_ready(continuous_embedding_forward(
        x2, weights, mask_f32, bias, in_size=in_size, out_size=out_size,
        use_pallas=True, out_dtype=jnp.bfloat16))
    assert out4.dtype == jnp.bfloat16
    assert jnp.allclose(out4.astype(jnp.float32), ref2, atol=5e-2, rtol=5e-2)

    # 5) Module at init: mask polarities cancel, output is just the bias broadcast.
    out5 = jax.block_until_ready(continuous_embedding_forward(
        x, weights_init, mask_f32, bias, in_size=in_size, out_size=out_size,
        use_pallas=True))
    assert jnp.allclose(out5, jnp.broadcast_to(
        bias.reshape(1, in_size, out_size), (N, in_size, out_size)),
        atol=1e-5, rtol=1e-5)

    print("KERNEL_OK")
</pallas_src>

<mosaic_0001>
module attributes {stable_mosaic.version = 11 : i64} {
  func.func @_cont_emb_kernel(%arg0: i32, %arg1: i32, %arg2: memref<16x8xf32, #tpu.memory_space<vmem>>, %arg3: memref<8x256xf32, #tpu.memory_space<vmem>>, %arg4: memref<1x256xf32, #tpu.memory_space<vmem>>, %arg5: memref<16x256xf32, #tpu.memory_space<vmem>>) attributes {dimension_semantics = [#tpu.dimension_semantics<parallel>, #tpu.dimension_semantics<parallel>], iteration_bounds = array<i64: 1, 1>, scalar_prefetch = 0 : i64, scratch_operands = 0 : i64, tpu.core_type = #tpu.core_type<tc>, window_params = [{transform_indices = @transform_0, window_bounds = array<i64: 16, 8>}, {pipeline_mode = #tpu.pipeline_mode<synchronous>, transform_indices = @transform_1, window_bounds = array<i64: 8, 256>}, {pipeline_mode = #tpu.pipeline_mode<synchronous>, transform_indices = @transform_2, window_bounds = array<i64: 1, 256>}, {transform_indices = @transform_3, window_bounds = array<i64: 16, 256>}]} {
    %c0 = arith.constant 0 : index
    %c0_0 = arith.constant 0 : index
    %0 = vector.load %arg2[%c0, %c0_0] : memref<16x8xf32, #tpu.memory_space<vmem>>, vector<16x8xf32>
    %c0_1 = arith.constant 0 : index
    %c0_2 = arith.constant 0 : index
    %1 = vector.load %arg3[%c0_1, %c0_2] : memref<8x256xf32, #tpu.memory_space<vmem>>, vector<8x256xf32>
    %cst = arith.constant dense<0.000000e+00> : vector<16x256xf32>
    %2 = tpu.matmul %0, %1, %cst {dimension_numbers = #tpu.dot_dimension_numbers<[1], [0], [0], [1], [0, 0, 1, 1], [], []>} : vector<16x8xf32>, vector<8x256xf32>, vector<16x256xf32> -> vector<16x256xf32>
    %c0_3 = arith.constant 0 : index
    %c0_4 = arith.constant 0 : index
    %3 = vector.load %arg4[%c0_3, %c0_4] : memref<1x256xf32, #tpu.memory_space<vmem>>, vector<1x256xf32>
    %4 = vector.broadcast %3 : vector<1x256xf32> to vector<16x256xf32>
    %5 = arith.addf %2, %4 : vector<16x256xf32>
    %c0_5 = arith.constant 0 : index
    %c0_6 = arith.constant 0 : index
    %6 = vector.load %arg5[%c0_5, %c0_6] : memref<16x256xf32, #tpu.memory_space<vmem>>, vector<16x256xf32>
    tpu.vector_store %arg5[%c0_5, %c0_6], %5 {strides = array<i32>} : memref<16x256xf32, #tpu.memory_space<vmem>>, vector<16x256xf32>,
    return
  }
  func.func @transform_0(%arg0: i32, %arg1: i32) -> (i32, i32) {
    %c0_i32 = arith.constant 0 : i32
    %c0_i32_0 = arith.constant 0 : i32
    return %arg0, %c0_i32 : i32, i32
  }
  func.func @transform_1(%arg0: i32, %arg1: i32) -> (i32, i32) {
    %c0_i32 = arith.constant 0 : i32
    %c0_i32_0 = arith.constant 0 : i32
    return %c0_i32, %arg1 : i32, i32
  }
  func.func @transform_2(%arg0: i32, %arg1: i32) -> (i32, i32) {
    %c0_i32 = arith.constant 0 : i32
    %c0_i32_0 = arith.constant 0 : i32
    return %c0_i32, %arg1 : i32, i32
  }
  func.func @transform_3(%arg0: i32, %arg1: i32) -> (i32, i32) {
    %c0_i32 = arith.constant 0 : i32
    return %arg0, %arg1 : i32, i32
  }
}

module attributes {stable_mosaic.version = 11 : i64} {
  func.func @_cont_emb_kernel(%arg0: i32, %arg1: i32, %arg2: memref<16x8xf32, #tpu.memory_space<vmem>>, %arg3: memref<8x256xf32, #tpu.memory_space<vmem>>, %arg4: memref<1x256xf32, #tpu.memory_space<vmem>>, %arg5: memref<16x256xf32, #tpu.memory_space<vmem>>) attributes {dimension_semantics = [#tpu.dimension_semantics<parallel>, #tpu.dimension_semantics<parallel>], iteration_bounds = array<i64: 1, 1>, scalar_prefetch = 0 : i64, scratch_operands = 0 : i64, tpu.core_type = #tpu.core_type<tc>, window_params = [{transform_indices = @transform_0, window_bounds = array<i64: 16, 8>}, {transform_indices = @transform_1, window_bounds = array<i64: 8, 256>}, {transform_indices = @transform_2, window_bounds = array<i64: 1, 256>}, {transform_indices = @transform_3, window_bounds = array<i64: 16, 256>}]} {
    %c0 = arith.constant 0 : index
    %c0_0 = arith.constant 0 : index
    %0 = vector.load %arg2[%c0, %c0_0] : memref<16x8xf32, #tpu.memory_space<vmem>>, vector<16x8xf32>
    %c0_1 = arith.constant 0 : index
    %c0_2 = arith.constant 0 : index
    %1 = vector.load %arg3[%c0_1, %c0_2] : memref<8x256xf32, #tpu.memory_space<vmem>>, vector<8x256xf32>
    %cst = arith.constant dense<0.000000e+00> : vector<16x256xf32>
    %2 = tpu.matmul %0, %1, %cst {dimension_numbers = #tpu.dot_dimension_numbers<[1], [0], [0], [1], [0, 0, 1, 1], [], []>} : vector<16x8xf32>, vector<8x256xf32>, vector<16x256xf32> -> vector<16x256xf32>
    %c0_3 = arith.constant 0 : index
    %c0_4 = arith.constant 0 : index
    %3 = vector.load %arg4[%c0_3, %c0_4] : memref<1x256xf32, #tpu.memory_space<vmem>>, vector<1x256xf32>
    %4 = vector.broadcast %3 : vector<1x256xf32> to vector<16x256xf32>
    %5 = arith.addf %2, %4 : vector<16x256xf32>
    %c0_5 = arith.constant 0 : index
    %c0_6 = arith.constant 0 : index
    %6 = vector.load %arg5[%c0_5, %c0_6] : memref<16x256xf32, #tpu.memory_space<vmem>>, vector<16x256xf32>
    tpu.vector_store %arg5[%c0_5, %c0_6], %5 {strides = array<i32>} : memref<16x256xf32, #tpu.memory_space<vmem>>, vector<16x256xf32>,
    return
  }
  func.func @transform_0(%arg0: i32, %arg1: i32) -> (i32, i32) {
    %c0_i32 = arith.constant 0 : i32
    %c0_i32_0 = arith.constant 0 : i32
    return %arg0, %c0_i32 : i32, i32
  }
  func.func @transform_1(%arg0: i32, %arg1: i32) -> (i32, i32) {
    %c0_i32 = arith.constant 0 : i32
    %c0_i32_0 = arith.constant 0 : i32
    return %c0_i32, %arg1 : i32, i32
  }
  func.func @transform_2(%arg0: i32, %arg1: i32) -> (i32, i32) {
    %c0_i32 = arith.constant 0 : i32
    %c0_i32_0 = arith.constant 0 : i32
    return %c0_i32, %arg1 : i32, i32
  }
  func.func @transform_3(%arg0: i32, %arg1: i32) -> (i32, i32) {
    %c0_i32 = arith.constant 0 : i32
    return %arg0, %arg1 : i32, i32
  }
}

</mosaic_0001>

<bundles_post_ra>
// kernel: tpu_custom_call.1
= control target key start
LH: loop header
LB: loop body
LE: loop exit
PB: predicated region body
PF: predicated region fallthrough
CT: control target
= control target key end

     0   :  { %vm31_vm0 = vcmask 64512   ;;  %s207_s0 = inlined_call_operand.vmem [shape: f32[16,8], index: 0, kind: input, shape index: {}]   ;;  %s208_s1 = inlined_call_operand.vmem [shape: f32[8,256], index: 1, kind: input, shape index: {}]   ;;  %s209_s2 = inlined_call_operand.vmem [shape: f32[1,256], index: 2, kind: input, shape index: {}]   ;;  %s210_s3 = inlined_call_operand.hbm [shape: f32[16,256], index: 3, kind: output, shape index: {}]  }
   0x1   :  { %v18_v0 = vld [vmem:[%s208_s1 + $0x8] sm:$0xff]  ;;  %v17_v1 = vld [vmem:[%s208_s1] sm:$0xff] }
   0x2   :  { %68 = vmatprep.subr.mxu0 %v18_v0  ;;  %137 = vmatprep.subr.mxu1 %v18_v0  ;;  %v15_v2 = vld [vmem:[%s207_s0] sm:$0xff]  ;;  %v16_v3 = vld [vmem:[%s207_s0 + $0x8] sm:$0xff] }
   0x3   :  { %8 = vsyncpa [#allocation3], 0  ;;  %69 = vmatpush1.msra.mxu0 %v17_v1  ;;  %138 = vmatpush1.msra.mxu1 %v17_v1  ;;  %v165_v4 = vmov 0.0   ;;  %v21_v5 = vlaneseq  ;;  %v19_v8 = vld [vmem:[%s209_s2] sm:$0x3]  ;;  %s166_s21 = smov [#allocation2]  }
   0x4   :  { %102 = vmatprep.mubr.f32.mxu0 %v165_v4  ;;  %108 = vmatprep.mubr.f32.mxu1 %v165_v4  ;;  %s124_s0 = sshll.u32 %s166_s21, 4  ;;  %s125_s0 = int_to_ptr.vmem [resolvable:$true] %s124_s0 }
   0x5   :  { %135 = vmatmul.mubr.msk.f32.vlgmr.msra.gmra.mxu0 %vm31_vm0, %v15_v2  ;;  %136 = vmatmul.mubr.msk.f32.vlgmr.msra.gmra.mxu1 %vm31_vm0, %v16_v3  ;;  %v22_v6 = vshrl.u32 %v21_v5, 7  ;;  %s143_s22 = scalar_lea.vmem %s125_s0, 512  ;;  %p148_p1 = scmp.lt.s32.totalorder %s125_s0, %s125_s0 }
   0x6   :  { %p144_p0 = scmp.ne.s32.totalorder %s125_s0, %s143_s22  ;;  %p149_p2 = scmp.lt.s32.totalorder %s143_s22, %s143_s22 }
   0x7   :  { %v23_v7 = vsub.s32 0, %v22_v6  ;;  %v27_v9 = vsub.s32 1, %v22_v6 }
   0x8   :  { %p150_p3 = por %p149_p2, %p148_p1 }
   0x9   :  { %v24_v10 = vrot.slane %v19_v8, %v23_v7  ;;  %v28_v11 = vrot.slane %v19_v8, %v27_v9 }
   0xa   :  { %p151_p4 = pnand %p150_p3, %p144_p0 }
  0xc5   :  { %v104_v12 = vpop.f32.mrf.mxu0  ;;  %v110_v13 = vpop.f32.mrf.mxu1 }
  0xc6   :  { %v105_v14 = vadd.f32 %v104_v12, %v24_v10  ;;  %v111_v15 = vadd.f32 %v110_v13, %v24_v10 }
  0xc7   :  { %v106_v16 = vpop.f32.mrf.mxu0  ;;  %v112_v17 = vpop.f32.mrf.mxu1 }
  0xc8   :  { %115 = vst [vmem:[#allocation2] sm:$0xff] %v105_v14  ;;  %117 = vst [vmem:[#allocation2 + $0x10] sm:$0xff] %v111_v15  ;;  %v107_v18 = vadd.f32 %v106_v16, %v28_v11  ;;  %v113_v19 = vadd.f32 %v112_v17, %v28_v11 }
  0xca   :  { %116 = vst [vmem:[#allocation2 + $0x8] sm:$0xff] %v107_v18  ;;  %118 = vst [vmem:[#allocation2 + $0x18] sm:$0xff] %v113_v19 }
  0xcb   :  { %154 = shalt.err (!%p151_p4)
}
  0xcc   :  { %s167_s2 = smov 256   ;;  %s168_s23 = smov 16  }
  0xcd   :  { %130 = dma.vmem_to_hbm [thread:$0]  %s125_s0, 512, %s210_s3, [#allocation3], %s167_s2, %s167_s2, %s168_s23  }
  0xce   :  { %163 = dma.done.wait [#allocation3], 512  }
  0xcf   :  { %164 = vsyncadd [#allocation3], 4294966784 }
  0xd0   :  { %134 = vsyncpa [#allocation3], 1 }

// kernel: tpu_custom_call.1
= control target key start
LH: loop header
LB: loop body
LE: loop exit
PB: predicated region body
PF: predicated region fallthrough
CT: control target
= control target key end

     0   :  { %vm31_vm0 = vcmask 64512   ;;  %s207_s0 = inlined_call_operand.vmem [shape: f32[16,8], index: 0, kind: input, shape index: {}]   ;;  %s208_s1 = inlined_call_operand.vmem [shape: f32[8,256], index: 1, kind: input, shape index: {}]   ;;  %s209_s2 = inlined_call_operand.vmem [shape: f32[1,256], index: 2, kind: input, shape index: {}]   ;;  %s210_s3 = inlined_call_operand.hbm [shape: f32[16,256], index: 3, kind: output, shape index: {}]  }
   0x1   :  { %v18_v0 = vld [vmem:[%s208_s1 + $0x8] sm:$0xff]  ;;  %v17_v1 = vld [vmem:[%s208_s1] sm:$0xff] }
   0x2   :  { %68 = vmatprep.subr.mxu0 %v18_v0  ;;  %137 = vmatprep.subr.mxu1 %v18_v0  ;;  %v15_v2 = vld [vmem:[%s207_s0] sm:$0xff]  ;;  %v16_v3 = vld [vmem:[%s207_s0 + $0x8] sm:$0xff] }
   0x3   :  { %8 = vsyncpa [#allocation3], 0  ;;  %69 = vmatpush1.msra.mxu0 %v17_v1  ;;  %138 = vmatpush1.msra.mxu1 %v17_v1  ;;  %v165_v4 = vmov 0.0   ;;  %v21_v5 = vlaneseq  ;;  %v19_v8 = vld [vmem:[%s209_s2] sm:$0x3]  ;;  %s166_s21 = smov [#allocation2]  }
   0x4   :  { %102 = vmatprep.mubr.f32.mxu0 %v165_v4  ;;  %108 = vmatprep.mubr.f32.mxu1 %v165_v4  ;;  %s124_s0 = sshll.u32 %s166_s21, 4  ;;  %s125_s0 = int_to_ptr.vmem [resolvable:$true] %s124_s0 }
   0x5   :  { %135 = vmatmul.mubr.msk.f32.vlgmr.msra.gmra.mxu0 %vm31_vm0, %v15_v2  ;;  %136 = vmatmul.mubr.msk.f32.vlgmr.msra.gmra.mxu1 %vm31_vm0, %v16_v3  ;;  %v22_v6 = vshrl.u32 %v21_v5, 7  ;;  %s143_s22 = scalar_lea.vmem %s125_s0, 512  ;;  %p148_p1 = scmp.lt.s32.totalorder %s125_s0, %s125_s0 }
   0x6   :  { %p144_p0 = scmp.ne.s32.totalorder %s125_s0, %s143_s22  ;;  %p149_p2 = scmp.lt.s32.totalorder %s143_s22, %s143_s22 }
   0x7   :  { %v23_v7 = vsub.s32 0, %v22_v6  ;;  %v27_v9 = vsub.s32 1, %v22_v6 }
   0x8   :  { %p150_p3 = por %p149_p2, %p148_p1 }
   0x9   :  { %v24_v10 = vrot.slane %v19_v8, %v23_v7  ;;  %v28_v11 = vrot.slane %v19_v8, %v27_v9 }
   0xa   :  { %p151_p4 = pnand %p150_p3, %p144_p0 }
  0xc5   :  { %v104_v12 = vpop.f32.mrf.mxu0  ;;  %v110_v13 = vpop.f32.mrf.mxu1 }
  0xc6   :  { %v105_v14 = vadd.f32 %v104_v12, %v24_v10  ;;  %v111_v15 = vadd.f32 %v110_v13, %v24_v10 }
  0xc7   :  { %v106_v16 = vpop.f32.mrf.mxu0  ;;  %v112_v17 = vpop.f32.mrf.mxu1 }
  0xc8   :  { %115 = vst [vmem:[#allocation2] sm:$0xff] %v105_v14  ;;  %117 = vst [vmem:[#allocation2 + $0x10] sm:$0xff] %v111_v15  ;;  %v107_v18 = vadd.f32 %v106_v16, %v28_v11  ;;  %v113_v19 = vadd.f32 %v112_v17, %v28_v11 }
  0xca   :  { %116 = vst [vmem:[#allocation2 + $0x8] sm:$0xff] %v107_v18  ;;  %118 = vst [vmem:[#allocation2 + $0x18] sm:$0xff] %v113_v19 }
  0xcb   :  { %154 = shalt.err (!%p151_p4)
}
  0xcc   :  { %s167_s2 = smov 256   ;;  %s168_s23 = smov 16  }
  0xcd   :  { %130 = dma.vmem_to_hbm [thread:$0]  %s125_s0, 512, %s210_s3, [#allocation3], %s167_s2, %s167_s2, %s168_s23  }
  0xce   :  { %163 = dma.done.wait [#allocation3], 512  }
  0xcf   :  { %164 = vsyncadd [#allocation3], 4294966784 }
  0xd0   :  { %134 = vsyncpa [#allocation3], 1 }

</bundles_post_ra>
